<compile_context>
chip_gen: v5e
topology: v5e:2x2
jax: 0.10.0
libtpu: 0.0.40
codegen_flags: <defaults>
</compile_context>

<pallas_src>
import functools

import jax
import jax.numpy as jnp
from jax.experimental import pallas as pl
from jax.experimental.pallas import tpu as pltpu


# ---------------------------------------------------------------------------
# Fused Pallas kernel: whole DQNWithPrior forward in one body.
# refs = (x, w0, b0, w1, b1, ..., w_{L-1}, b_{L-1}, out)
# ---------------------------------------------------------------------------
def _fused_dqn_prior_kernel(*refs, num_layers):
    x_ref = refs[0]
    o_ref = refs[-1]
    h = x_ref[...]                                    # (M, d0) f32
    for i in range(num_layers):
        w = refs[1 + 2 * i][...]                      # (K_i, N_i) pre-transposed
        b = refs[2 + 2 * i][...]                      # (1, N_i)
        h = jnp.dot(h, w, preferred_element_type=jnp.float32) + b
        if i < num_layers - 1:
            h = jnp.maximum(h, 0.0)                   # ReLU on packed [h_d|h_p]
    o_ref[...] = h.astype(o_ref.dtype)


# ---------------------------------------------------------------------------
# Wrapper: single pallas_call, everything in VMEM, no grid.
# ---------------------------------------------------------------------------
@functools.partial(jax.jit, static_argnames=("num_layers",))
def _fused_forward(x, flat_params, *, num_layers):
    M = x.shape[0]
    N = flat_params[-2].shape[1]                      # final packed weight (K, N)
    vmem = pl.BlockSpec(memory_space=pltpu.MemorySpace.VMEM)
    args = (x, *flat_params)
    return pl.pallas_call(
        functools.partial(_fused_dqn_prior_kernel, num_layers=num_layers),
        out_shape=jax.ShapeDtypeStruct((M, N), jnp.float32),
        in_specs=[vmem] * len(args),
        out_specs=vmem,
    )(*args)


def dqn_with_prior_forward(x, packed_params):
    """x: (M, d0) f32. packed_params: list of (W_packed, b_packed)."""
    flat = []
    for (w, b) in packed_params:
        flat.append(w)
        flat.append(b)
    return _fused_forward(x, tuple(flat), num_layers=len(packed_params))


# ---------------------------------------------------------------------------
# Parameter construction (mirrors MLP.initialize(): xavier_uniform_ weights,
# bias filled with 0.01; PyTorch (out, in) layout).
# ---------------------------------------------------------------------------
def init_mlp_params(key, dimensions):
    params = []
    for i in range(len(dimensions) - 1):
        fan_in, fan_out = dimensions[i], dimensions[i + 1]
        key, sub = jax.random.split(key)
        limit = jnp.sqrt(6.0 / (fan_in + fan_out))
        w = jax.random.uniform(sub, (fan_out, fan_in), jnp.float32,
                               minval=-limit, maxval=limit)   # PyTorch (out, in)
        b = jnp.full((fan_out,), 0.01, jnp.float32)
        params.append((w, b))
    return params, key


def pack_dqn_params(diff_params, prior_params, scale):
    """One-time packing: transpose to (in, out) and merge both networks into a
    single matmul chain; the scale and the final add are folded into the last
    packed weight/bias."""
    n = len(diff_params)
    scale = jnp.float32(scale)
    packed = []
    for i in range(n):
        wd, bd = diff_params[i]
        wp, bp = prior_params[i]
        wdt, wpt = wd.T, wp.T                          # (in, out)
        if n == 1:
            # Single linear layer: out = x @ (Wd^T + s*Wp^T) + (bd + s*bp).
            w = wdt + scale * wpt
            b = (bd + scale * bp).reshape(1, -1)
        elif i == 0:
            w = jnp.concatenate([wdt, wpt], axis=1)                       # (d0, 2*d1)
            b = jnp.concatenate([bd, bp]).reshape(1, -1)
        elif i < n - 1:
            top = jnp.concatenate([wdt, jnp.zeros_like(wdt)], axis=1)
            bot = jnp.concatenate([jnp.zeros_like(wpt), wpt], axis=1)
            w = jnp.concatenate([top, bot], axis=0)                       # block diag
            b = jnp.concatenate([bd, bp]).reshape(1, -1)
        else:
            w = jnp.concatenate([wdt, scale * wpt], axis=0)               # (2*d, d_out)
            b = (bd + scale * bp).reshape(1, -1)
        packed.append((w.astype(jnp.float32), b.astype(jnp.float32)))
    return packed


# ---------------------------------------------------------------------------
# Pure-JAX reference (unpacked params) for sanity checking.
# ---------------------------------------------------------------------------
def _reference_forward(x, diff_params, prior_params, scale):
    def mlp(h, params):
        for (w, b) in params[:-1]:
            h = jax.nn.relu(h @ w.T + b)
        w, b = params[-1]
        return h @ w.T + b
    return mlp(x, diff_params) + jnp.float32(scale) * mlp(x, prior_params)


if __name__ == "__main__":
    dimensions = [16, 32, 32, 8]   # small MLP: 16 -> 32 -> 32 -> 8
    scale = 5
    batch = 2

    key = jax.random.PRNGKey(0)
    key, xkey = jax.random.split(key)
    x = jax.random.normal(xkey, (batch, dimensions[0]), jnp.float32)

    diff_params, key = init_mlp_params(key, dimensions)
    prior_params, key = init_mlp_params(key, dimensions)
    packed_params = pack_dqn_params(diff_params, prior_params, scale)

    out = dqn_with_prior_forward(x, packed_params)
    out = jax.block_until_ready(out)

    ref = _reference_forward(x, diff_params, prior_params, scale)
    assert out.shape == (batch, dimensions[-1])
    assert jnp.allclose(out, ref, atol=1e-4, rtol=1e-3), "mismatch vs reference"

    # TODO(synk): if used as a bootstrapped-DQN ensemble or with a real batch,
    # stack members/batch so M,N reach >=128 for meaningful MXU utilization.
    print("KERNEL_OK")
</pallas_src>

<mosaic_0001>
module attributes {stable_mosaic.version = 11 : i64} {
  func.func @_fused_dqn_prior_kernel(%arg0: memref<2x16xf32, #tpu.memory_space<vmem>>, %arg1: memref<16x64xf32, #tpu.memory_space<vmem>>, %arg2: memref<1x64xf32, #tpu.memory_space<vmem>>, %arg3: memref<64x64xf32, #tpu.memory_space<vmem>>, %arg4: memref<1x64xf32, #tpu.memory_space<vmem>>, %arg5: memref<64x8xf32, #tpu.memory_space<vmem>>, %arg6: memref<1x8xf32, #tpu.memory_space<vmem>>, %arg7: memref<2x8xf32, #tpu.memory_space<vmem>>) attributes {dimension_semantics = [], scalar_prefetch = 0 : i64, scratch_operands = 0 : i64, tpu.core_type = #tpu.core_type<tc>} {
    %c0 = arith.constant 0 : index
    %c0_0 = arith.constant 0 : index
    %0 = vector.load %arg0[%c0, %c0_0] : memref<2x16xf32, #tpu.memory_space<vmem>>, vector<2x16xf32>
    %c0_1 = arith.constant 0 : index
    %c0_2 = arith.constant 0 : index
    %1 = vector.load %arg1[%c0_1, %c0_2] : memref<16x64xf32, #tpu.memory_space<vmem>>, vector<16x64xf32>
    %c0_3 = arith.constant 0 : index
    %c0_4 = arith.constant 0 : index
    %2 = vector.load %arg2[%c0_3, %c0_4] : memref<1x64xf32, #tpu.memory_space<vmem>>, vector<1x64xf32>
    %cst = arith.constant dense<0.000000e+00> : vector<2x64xf32>
    %3 = tpu.matmul %0, %1, %cst {dimension_numbers = #tpu.dot_dimension_numbers<[1], [0], [0], [1], [0, 0, 1, 1], [], []>} : vector<2x16xf32>, vector<16x64xf32>, vector<2x64xf32> -> vector<2x64xf32>
    %4 = vector.broadcast %2 : vector<1x64xf32> to vector<2x64xf32>
    %5 = arith.addf %3, %4 : vector<2x64xf32>
    %cst_5 = arith.constant 0.000000e+00 : f32
    %6 = vector.broadcast %cst_5 : f32 to vector<2x64xf32>
    %7 = arith.maximumf %5, %6 : vector<2x64xf32>
    %c0_6 = arith.constant 0 : index
    %c0_7 = arith.constant 0 : index
    %8 = vector.load %arg3[%c0_6, %c0_7] : memref<64x64xf32, #tpu.memory_space<vmem>>, vector<64x64xf32>
    %c0_8 = arith.constant 0 : index
    %c0_9 = arith.constant 0 : index
    %9 = vector.load %arg4[%c0_8, %c0_9] : memref<1x64xf32, #tpu.memory_space<vmem>>, vector<1x64xf32>
    %cst_10 = arith.constant dense<0.000000e+00> : vector<2x64xf32>
    %10 = tpu.matmul %7, %8, %cst_10 {dimension_numbers = #tpu.dot_dimension_numbers<[1], [0], [0], [1], [0, 0, 1, 1], [], []>} : vector<2x64xf32>, vector<64x64xf32>, vector<2x64xf32> -> vector<2x64xf32>
    %11 = vector.broadcast %9 : vector<1x64xf32> to vector<2x64xf32>
    %12 = arith.addf %10, %11 : vector<2x64xf32>
    %cst_11 = arith.constant 0.000000e+00 : f32
    %13 = vector.broadcast %cst_11 : f32 to vector<2x64xf32>
    %14 = arith.maximumf %12, %13 : vector<2x64xf32>
    %c0_12 = arith.constant 0 : index
    %c0_13 = arith.constant 0 : index
    %15 = vector.load %arg5[%c0_12, %c0_13] : memref<64x8xf32, #tpu.memory_space<vmem>>, vector<64x8xf32>
    %c0_14 = arith.constant 0 : index
    %c0_15 = arith.constant 0 : index
    %16 = vector.load %arg6[%c0_14, %c0_15] : memref<1x8xf32, #tpu.memory_space<vmem>>, vector<1x8xf32>
    %cst_16 = arith.constant dense<0.000000e+00> : vector<2x8xf32>
    %17 = tpu.matmul %14, %15, %cst_16 {dimension_numbers = #tpu.dot_dimension_numbers<[1], [0], [0], [1], [0, 0, 1, 1], [], []>} : vector<2x64xf32>, vector<64x8xf32>, vector<2x8xf32> -> vector<2x8xf32>
    %18 = vector.broadcast %16 : vector<1x8xf32> to vector<2x8xf32>
    %19 = arith.addf %17, %18 : vector<2x8xf32>
    %c0_17 = arith.constant 0 : index
    %c0_18 = arith.constant 0 : index
    %20 = vector.load %arg7[%c0_17, %c0_18] : memref<2x8xf32, #tpu.memory_space<vmem>>, vector<2x8xf32>
    tpu.vector_store %arg7[%c0_17, %c0_18], %19 {strides = array<i32>} : memref<2x8xf32, #tpu.memory_space<vmem>>, vector<2x8xf32>,
    return
  }
}

</mosaic_0001>

<bundles_post_ra>
// kernel: _fused_forward.1
= control target key start
LH: loop header
LB: loop body
LE: loop exit
PB: predicated region body
PF: predicated region fallthrough
CT: control target
= control target key end

     0   :  { %12 = vsyncpa [#allocation3], 0  ;;  %s338_s0 = inlined_call_operand.vmem [shape: f32[2,16], index: 0, kind: input, shape index: {}]   ;;  %s339_s1 = inlined_call_operand.hbm [shape: f32[16,64], index: 1, kind: input, shape index: {}]   ;;  %s340_s2 = inlined_call_operand.vmem [shape: f32[1,64], index: 2, kind: input, shape index: {}]   ;;  %s341_s3 = inlined_call_operand.vmem [shape: f32[64,64], index: 3, kind: input, shape index: {}]   ;;  %s342_s4 = inlined_call_operand.vmem [shape: f32[1,64], index: 4, kind: input, shape index: {}]   ;;  %s343_s5 = inlined_call_operand.vmem [shape: f32[64,8], index: 5, kind: input, shape index: {}]   ;;  %s344_s6 = inlined_call_operand.vmem [shape: f32[1,8], index: 6, kind: input, shape index: {}]   ;;  %s345_s7 = inlined_call_operand.hbm [shape: f32[2,8], index: 7, kind: output, shape index: {}]  }
   0x1   :  { %13 = vsyncpa [#allocation4], 0  ;;  %s20_s26 = sshll.u32 %s339_s1, 4  ;;  %s228_s27 = smov [#allocation2]   ;;  %s21_s26 = int_to_ptr.hbm [resolvable:$true] %s20_s26 }
   0x2   :  { %s22_s28 = sshll.u32 %s228_s27, 4  ;;  %s229_s29 = smov 128   ;;  %s23_s28 = int_to_ptr.vmem [resolvable:$true] %s22_s28 }
   0x3   :  { %s230_s30 = smov 8  }
   0x4   :  { %28 = dma.hbm_to_vmem [thread:$0]  %s21_s26, 256, %s23_s28, [#allocation3], %s229_s29, %s229_s29, %s230_s30  }
   0x5   :  { %224 = dma.done.wait [#allocation3], 256  }
   0x6   :  { %225 = vsyncadd [#allocation3], 4294967040  ;;  %v45_v0 = vld [vmem:[#allocation2 + $0x8] sm:$0xff]  ;;  %v44_v1 = vld [vmem:[#allocation2] sm:$0xff]  ;;  %vm50_vm0 = vcmask 130048   ;;  %vm87_vm1 = vcmask 523264  }
   0x7   :  { %68 = vmatpush.msra.mxu0 %v45_v0  ;;  %v43_v2 = vld [vmem:[%s338_s0] sm:$0x3]  ;;  %v82_v3 = vld [vmem:[%s341_s3 + $0x38] sm:$0xff]  ;;  %v81_v4 = vld [vmem:[%s341_s3 + $0x30] sm:$0xff]  ;;  %s231_s19 = smov [#allocation5]   ;;  %s156_s23 = sshll.u32 %s345_s7, 4  ;;  %s157_s23 = int_to_ptr.hbm [resolvable:$true] %s156_s23 }
   0x8   :  { %99 = vmatpush.msra.mxu1 %v82_v3  ;;  %v80_v5 = vld [vmem:[%s341_s3 + $0x28] sm:$0xff]  ;;  %v79_v6 = vld [vmem:[%s341_s3 + $0x20] sm:$0xff]  ;;  %v78_v7 = vld [vmem:[%s341_s3 + $0x18] sm:$0xff]  ;;  %s154_s20 = sshll.u32 %s231_s19, 4  ;;  %vm147_vm2 = vcmask 58368   ;;  %s155_s20 = int_to_ptr.vmem [resolvable:$true] %s154_s20 }
   0x9   :  { %69 = vmatpush.msra.mxu0 %v44_v1  ;;  %v77_v8 = vld [vmem:[%s341_s3 + $0x10] sm:$0xff]  ;;  %v76_v9 = vld [vmem:[%s341_s3 + $0x8] sm:$0xff]  ;;  %v75_v10 = vld [vmem:[%s341_s3] sm:$0xff] }
   0xa   :  { %166 = vmatmul.msk.f32.vlgmr.msra.gmra.mxu0 %vm50_vm0, %v43_v2  ;;  %100 = vmatpush.msra.mxu1 %v81_v4  ;;  %v119_v11 = vld [vmem:[%s343_s5 + $0x38] sm:$0xff]  ;;  %v118_v12 = vld [vmem:[%s343_s5 + $0x30] sm:$0xff]  ;;  %v117_v13 = vld [vmem:[%s343_s5 + $0x28] sm:$0xff] }
   0xb   :  { %135 = vmatpush.msra.mxu2 %v119_v11  ;;  %v116_v14 = vld [vmem:[%s343_s5 + $0x20] sm:$0xff]  ;;  %v115_v15 = vld [vmem:[%s343_s5 + $0x18] sm:$0xff]  ;;  %v114_v20 = vld [vmem:[%s343_s5 + $0x10] sm:$0xff] }
   0xc   :  { %101 = vmatpush.msra.mxu1 %v80_v5  ;;  %v173_v16 = vld [vmem:[%s340_s2] ss:$0 sm:$0xff]  ;;  %v113_v21 = vld [vmem:[%s343_s5 + $0x8] sm:$0xff] }
   0xd   :  { %136 = vmatpush.msra.mxu2 %v118_v12  ;;  %v112_v22 = vld [vmem:[%s343_s5] sm:$0xff] }
   0xe   :  { %102 = vmatpush.msra.mxu1 %v79_v6  ;;  %v174_v23 = vld [vmem:[%s342_s4] ss:$0 sm:$0xff] }
   0xf   :  { %137 = vmatpush.msra.mxu2 %v117_v13  ;;  %v175_v27 = vld [vmem:[%s344_s6] ss:$0 sm:$0xff] }
  0x10   :  { %103 = vmatpush.msra.mxu1 %v78_v7 }
  0x11   :  { %138 = vmatpush.msra.mxu2 %v116_v14 }
  0x12   :  { %104 = vmatpush.msra.mxu1 %v77_v8 }
  0x13   :  { %139 = vmatpush.msra.mxu2 %v115_v15 }
  0x14   :  { %105 = vmatpush.msra.mxu1 %v76_v9 }
  0x15   :  { %140 = vmatpush.msra.mxu2 %v114_v20 }
  0x16   :  { %106 = vmatpush.msra.mxu1 %v75_v10 }
  0x17   :  { %141 = vmatpush.msra.mxu2 %v113_v21 }
  0x19   :  { %142 = vmatpush.msra.mxu2 %v112_v22 }
  0x87   :  { %v71_v17 = vpop.f32.mrf.mxu0 }
  0x88   :  { %v72_v18 = vadd.f32 %v173_v16, %v71_v17 }
  0x8a   :  { %v74_v19 = vmax.f32 %v72_v18, 0.0 }
  0x8c   :  { %167 = vmatmul.msk.f32.vlgmr.msra.gmra.mxu1 %vm87_vm1, %v74_v19 }
 0x109   :  { %v108_v24 = vpop.f32.mrf.mxu1 }
 0x10a   :  { %v109_v25 = vadd.f32 %v174_v23, %v108_v24 }
 0x10c   :  { %v111_v26 = vmax.f32 %v109_v25, 0.0 }
 0x10e   :  { %168 = vmatmul.msk.f32.vlgmr.msra.gmra.mxu2 %vm87_vm1, %v111_v26 }
 0x191   :  { %v144_v28 = vpop.f32.mrf.mxu2 }
 0x192   :  { %v145_v29 = vadd.f32 %v175_v27, %v144_v28 }
 0x194   :  { %148 = vst.msk [vmem:[#allocation5] sm:$0x3] %vm147_vm2, %v145_v29 }
 0x195   :  { %159 = dma.vmem_to_hbm [thread:$0]  %s155_s20, 32, %s157_s23, [#allocation4]  }
 0x196   :  { %226 = dma.done.wait [#allocation4], 32  }
 0x197   :  { %227 = vsyncadd [#allocation4], 4294967264 }
 0x198   :  { %164 = vsyncpa [#allocation3], 1 }
 0x199   :  { %165 = vsyncpa [#allocation4], 1 }

</bundles_post_ra>
